<compile_context>
chip_gen: v5e
topology: v5e:2x2
jax: 0.10.0
libtpu: 0.0.40
codegen_flags: <defaults>
</compile_context>

<pallas_src>
import jax
import jax.numpy as jnp
from jax.experimental import pallas as pl
from jax.experimental.pallas import tpu as pltpu

STATE_DIM = 4      # CartPole-v0 observation dim
ACTION_DIM = 2     # CartPole-v0 action dim
HIDDEN = 128
HEAD_PAD = 128     # lane-dense padded width of the fused head matmul output
MAX_TILE = 1024    # max rows per grid step
MIN_SPLIT = 512    # batches above this are split into >= 2 grid steps (v7x)


def dueling_dqn_kernel(x_ref, w1_ref, b1_ref, wva_ref, bva_ref,
                       wq_ref, bq_ref, q_ref):
    """3 fused MXU matmuls (bf16 operands, f32 accum); dueling combine is
    pre-folded into wq/bq so the epilogue is a single lane-dense store."""
    # feature = ReLU(x @ W1 + b1)                                      (tb, 128)
    h = jnp.dot(x_ref[...], w1_ref[...],
                preferred_element_type=jnp.float32) + b1_ref[...]
    h = jnp.maximum(h, 0.0)

    # fused value/advantage hidden layer: ReLU(h @ [Wv1 | Wa1] + b)    (tb, 256)
    hva = jnp.dot(h.astype(jnp.bfloat16), wva_ref[...],
                  preferred_element_type=jnp.float32) + bva_ref[...]
    hva = jnp.maximum(hva, 0.0)

    # fused dueling head (combine folded into weights):                (tb, 128)
    #   cols 0..A-1 = V + A - mean(A), remaining lanes are zero padding.
    q_ref[...] = jnp.dot(hva.astype(jnp.bfloat16), wq_ref[...],
                         preferred_element_type=jnp.float32) + bq_ref[...]


def fuse_params(p):
    """Fuse the two streams and fold the dueling combine into the head.

    Fold is done in f32 (cast to bf16 afterwards) so numerics match
    'combine of exact weights, then quantize'.
    """
    # value/advantage hidden layers side by side                    (128, 256)
    w_va = jnp.concatenate([p["wv1"], p["wa1"]], axis=1)
    b_va = jnp.concatenate([p["bv1"], p["ba1"]], axis=1)            # (1, 256)

    # q[:, a] = hv @ wv2 + bv2 + ha @ (wa2[:,a] - mean_a' wa2) + (ba2[:,a] - mean(ba2))
    wa2_c = p["wa2"] - jnp.mean(p["wa2"], axis=1, keepdims=True)    # (128, A)
    ba2_c = p["ba2"] - jnp.mean(p["ba2"], axis=1, keepdims=True)    # (1, A)

    w_q = jnp.zeros((2 * HIDDEN, HEAD_PAD), jnp.float32)
    w_q = w_q.at[:HIDDEN, :ACTION_DIM].set(
        jnp.broadcast_to(p["wv2"], (HIDDEN, ACTION_DIM)))
    w_q = w_q.at[HIDDEN:, :ACTION_DIM].set(wa2_c)                   # (256, 128)

    b_q = jnp.zeros((1, HEAD_PAD), jnp.float32)
    b_q = b_q.at[:, :ACTION_DIM].set(p["bv2"] + ba2_c)              # (1, 128)

    return dict(
        w1=p["w1"].astype(jnp.bfloat16), b1=p["b1"],
        w_va=w_va.astype(jnp.bfloat16), b_va=b_va,
        w_q=w_q.astype(jnp.bfloat16), b_q=b_q,
    )


def _pick_batch_tile(B):
    """Rows per grid step (multiple of 16 for clean bf16 sublane tiling)."""
    padded16 = 16 * pl.cdiv(B, 16)
    if padded16 <= MIN_SPLIT:
        return padded16                         # small batch: single tile
    # large batch: <= MAX_TILE rows/tile and >= 2 grid steps (v7x megacore)
    half = 16 * pl.cdiv(pl.cdiv(padded16, 2), 16)
    return min(MAX_TILE, half)


def dueling_dqn_forward(x, fused):
    """x: (B, STATE_DIM) f32/bf16. fused: output of fuse_params.
    Returns (B, ACTION_DIM) f32 Q-values."""
    B = x.shape[0]
    tb = _pick_batch_tile(B)
    padded_B = tb * pl.cdiv(B, tb)

    xb = x.astype(jnp.bfloat16)                 # halve input DMA bytes
    if padded_B != B:
        # pad only the remainder rows up to one tile boundary
        xb = jnp.pad(xb, ((0, padded_B - B), (0, 0)))

    grid = (padded_B // tb,)

    weight_args = (fused["w1"], fused["b1"], fused["w_va"], fused["b_va"],
                   fused["w_q"], fused["b_q"])

    def const_spec(shape):
        # full, constant-index block: weights stay resident across grid steps
        return pl.BlockSpec(shape, lambda i: (0, 0))

    in_specs = [pl.BlockSpec((tb, STATE_DIM), lambda i: (i, 0))]
    in_specs += [const_spec(w.shape) for w in weight_args]
    # lane-dense output block (128 wide); sliced to ACTION_DIM below
    out_spec = pl.BlockSpec((tb, HEAD_PAD), lambda i: (i, 0))

    q_padded = pl.pallas_call(
        dueling_dqn_kernel,
        out_shape=jax.ShapeDtypeStruct((padded_B, HEAD_PAD), jnp.float32),
        grid=grid,
        in_specs=in_specs,
        out_specs=out_spec,
        compiler_params=pltpu.CompilerParams(
            dimension_semantics=("parallel",)),
    )(xb, *weight_args)

    return q_padded[:B, :ACTION_DIM]


def init_params(key):
    """Deterministic init mimicking PyTorch nn.Linear default (U(-1/sqrt(fan_in), +))."""
    def linear(key, fan_in, fan_out):
        kw, kb = jax.random.split(key)
        bound = 1.0 / jnp.sqrt(fan_in)
        w = jax.random.uniform(kw, (fan_in, fan_out), jnp.float32, -bound, bound)
        b = jax.random.uniform(kb, (1, fan_out), jnp.float32, -bound, bound)
        return w, b

    k1, k2, k3, k4, k5 = jax.random.split(key, 5)
    w1, b1 = linear(k1, STATE_DIM, HIDDEN)
    wv1, bv1 = linear(k2, HIDDEN, HIDDEN)
    wv2, bv2 = linear(k3, HIDDEN, 1)
    wa1, ba1 = linear(k4, HIDDEN, HIDDEN)
    wa2, ba2 = linear(k5, HIDDEN, ACTION_DIM)
    return dict(w1=w1, b1=b1, wv1=wv1, bv1=bv1, wv2=wv2, bv2=bv2,
                wa1=wa1, ba1=ba1, wa2=wa2, ba2=ba2)


def reference_forward_f32(x, p):
    """Pure-JAX f32 reference (original PyTorch semantics)."""
    h = jnp.maximum(x @ p["w1"] + p["b1"], 0.0)
    v = jnp.maximum(h @ p["wv1"] + p["bv1"], 0.0) @ p["wv2"] + p["bv2"]
    a = jnp.maximum(h @ p["wa1"] + p["ba1"], 0.0) @ p["wa2"] + p["ba2"]
    return v + a - jnp.mean(a, axis=1, keepdims=True)


def reference_forward_bf16(x, fused):
    """Pure-JAX reference matching the kernel's bf16-weight / f32-accum /
    folded-combine numerics."""
    xb = x.astype(jnp.bfloat16)
    h = jnp.dot(xb, fused["w1"], preferred_element_type=jnp.float32) + fused["b1"]
    h = jnp.maximum(h, 0.0)
    hva = jnp.dot(h.astype(jnp.bfloat16), fused["w_va"],
                  preferred_element_type=jnp.float32) + fused["b_va"]
    hva = jnp.maximum(hva, 0.0)
    q = jnp.dot(hva.astype(jnp.bfloat16), fused["w_q"],
                preferred_element_type=jnp.float32) + fused["b_q"]
    return q[:, :ACTION_DIM]


if __name__ == "__main__":
    key = jax.random.PRNGKey(0)
    kx, kp = jax.random.split(key)

    batch = 8
    x = jax.random.normal(kx, (batch, STATE_DIM), dtype=jnp.float32)
    params = init_params(kp)
    fused = fuse_params(params)

    q = dueling_dqn_forward(x, fused)
    q = jax.block_until_ready(q)
    assert q.shape == (batch, ACTION_DIM)

    # tight check vs a reference mimicking the kernel's bf16/f32 numerics
    q_bf16_ref = reference_forward_bf16(x, fused)
    assert jnp.allclose(q, q_bf16_ref, atol=2e-3, rtol=2e-3), \
        "mismatch vs bf16 reference"

    # loose check vs the original full-f32 semantics (bf16 weight quantization)
    q_f32_ref = reference_forward_f32(x, params)
    assert jnp.allclose(q, q_f32_ref, atol=5e-2, rtol=5e-2), \
        "mismatch vs f32 reference"

    print("KERNEL_OK")
</pallas_src>

<mosaic_0001>
module attributes {stable_mosaic.version = 11 : i64} {
  func.func @dueling_dqn_kernel(%arg0: i32, %arg1: memref<16x4xbf16, #tpu.memory_space<vmem>>, %arg2: memref<4x128xbf16, #tpu.memory_space<vmem>>, %arg3: memref<1x128xf32, #tpu.memory_space<vmem>>, %arg4: memref<128x256xbf16, #tpu.memory_space<vmem>>, %arg5: memref<1x256xf32, #tpu.memory_space<vmem>>, %arg6: memref<256x128xbf16, #tpu.memory_space<vmem>>, %arg7: memref<1x128xf32, #tpu.memory_space<vmem>>, %arg8: memref<16x128xf32, #tpu.memory_space<vmem>>) attributes {dimension_semantics = [#tpu.dimension_semantics<parallel>], iteration_bounds = array<i64: 1>, scalar_prefetch = 0 : i64, scratch_operands = 0 : i64, tpu.core_type = #tpu.core_type<tc>, window_params = [{transform_indices = @transform_0, window_bounds = array<i64: 16, 4>}, {pipeline_mode = #tpu.pipeline_mode<synchronous>, transform_indices = @transform_1, window_bounds = array<i64: 4, 128>}, {pipeline_mode = #tpu.pipeline_mode<synchronous>, transform_indices = @transform_2, window_bounds = array<i64: 1, 128>}, {pipeline_mode = #tpu.pipeline_mode<synchronous>, transform_indices = @transform_3, window_bounds = array<i64: 128, 256>}, {pipeline_mode = #tpu.pipeline_mode<synchronous>, transform_indices = @transform_4, window_bounds = array<i64: 1, 256>}, {pipeline_mode = #tpu.pipeline_mode<synchronous>, transform_indices = @transform_5, window_bounds = array<i64: 256, 128>}, {pipeline_mode = #tpu.pipeline_mode<synchronous>, transform_indices = @transform_6, window_bounds = array<i64: 1, 128>}, {transform_indices = @transform_7, window_bounds = array<i64: 16, 128>}]} {
    %c0 = arith.constant 0 : index
    %c0_0 = arith.constant 0 : index
    %0 = vector.load %arg1[%c0, %c0_0] : memref<16x4xbf16, #tpu.memory_space<vmem>>, vector<16x4xbf16>
    %c0_1 = arith.constant 0 : index
    %c0_2 = arith.constant 0 : index
    %1 = vector.load %arg2[%c0_1, %c0_2] : memref<4x128xbf16, #tpu.memory_space<vmem>>, vector<4x128xbf16>
    %cst = arith.constant dense<0.000000e+00> : vector<16x128xf32>
    %2 = tpu.matmul %0, %1, %cst {dimension_numbers = #tpu.dot_dimension_numbers<[1], [0], [0], [1], [0, 0, 1, 1], [], []>} : vector<16x4xbf16>, vector<4x128xbf16>, vector<16x128xf32> -> vector<16x128xf32>
    %c0_3 = arith.constant 0 : index
    %c0_4 = arith.constant 0 : index
    %3 = vector.load %arg3[%c0_3, %c0_4] : memref<1x128xf32, #tpu.memory_space<vmem>>, vector<1x128xf32>
    %4 = vector.broadcast %3 : vector<1x128xf32> to vector<16x128xf32>
    %5 = arith.addf %2, %4 : vector<16x128xf32>
    %cst_5 = arith.constant 0.000000e+00 : f32
    %6 = vector.broadcast %cst_5 : f32 to vector<16x128xf32>
    %7 = arith.maximumf %5, %6 : vector<16x128xf32>
    %8 = arith.truncf %7 : vector<16x128xf32> to vector<16x128xbf16>
    %c0_6 = arith.constant 0 : index
    %c0_7 = arith.constant 0 : index
    %9 = vector.load %arg4[%c0_6, %c0_7] : memref<128x256xbf16, #tpu.memory_space<vmem>>, vector<128x256xbf16>
    %cst_8 = arith.constant dense<0.000000e+00> : vector<16x256xf32>
    %10 = tpu.matmul %8, %9, %cst_8 {dimension_numbers = #tpu.dot_dimension_numbers<[1], [0], [0], [1], [0, 0, 1, 1], [], []>} : vector<16x128xbf16>, vector<128x256xbf16>, vector<16x256xf32> -> vector<16x256xf32>
    %c0_9 = arith.constant 0 : index
    %c0_10 = arith.constant 0 : index
    %11 = vector.load %arg5[%c0_9, %c0_10] : memref<1x256xf32, #tpu.memory_space<vmem>>, vector<1x256xf32>
    %12 = vector.broadcast %11 : vector<1x256xf32> to vector<16x256xf32>
    %13 = arith.addf %10, %12 : vector<16x256xf32>
    %cst_11 = arith.constant 0.000000e+00 : f32
    %14 = vector.broadcast %cst_11 : f32 to vector<16x256xf32>
    %15 = arith.maximumf %13, %14 : vector<16x256xf32>
    %16 = arith.truncf %15 : vector<16x256xf32> to vector<16x256xbf16>
    %c0_12 = arith.constant 0 : index
    %c0_13 = arith.constant 0 : index
    %17 = vector.load %arg6[%c0_12, %c0_13] : memref<256x128xbf16, #tpu.memory_space<vmem>>, vector<256x128xbf16>
    %cst_14 = arith.constant dense<0.000000e+00> : vector<16x128xf32>
    %18 = tpu.matmul %16, %17, %cst_14 {dimension_numbers = #tpu.dot_dimension_numbers<[1], [0], [0], [1], [0, 0, 1, 1], [], []>} : vector<16x256xbf16>, vector<256x128xbf16>, vector<16x128xf32> -> vector<16x128xf32>
    %c0_15 = arith.constant 0 : index
    %c0_16 = arith.constant 0 : index
    %19 = vector.load %arg7[%c0_15, %c0_16] : memref<1x128xf32, #tpu.memory_space<vmem>>, vector<1x128xf32>
    %20 = vector.broadcast %19 : vector<1x128xf32> to vector<16x128xf32>
    %21 = arith.addf %18, %20 : vector<16x128xf32>
    %c0_17 = arith.constant 0 : index
    %c0_18 = arith.constant 0 : index
    %22 = vector.load %arg8[%c0_17, %c0_18] : memref<16x128xf32, #tpu.memory_space<vmem>>, vector<16x128xf32>
    tpu.vector_store %arg8[%c0_17, %c0_18], %21 {strides = array<i32>} : memref<16x128xf32, #tpu.memory_space<vmem>>, vector<16x128xf32>,
    return
  }
  func.func @transform_0(%arg0: i32) -> (i32, i32) {
    %c0_i32 = arith.constant 0 : i32
    %c0_i32_0 = arith.constant 0 : i32
    return %arg0, %c0_i32 : i32, i32
  }
  func.func @transform_1(%arg0: i32) -> (i32, i32) {
    %c0_i32 = arith.constant 0 : i32
    %c0_i32_0 = arith.constant 0 : i32
    %c0_i32_1 = arith.constant 0 : i32
    return %c0_i32, %c0_i32_0 : i32, i32
  }
  func.func @transform_2(%arg0: i32) -> (i32, i32) {
    %c0_i32 = arith.constant 0 : i32
    %c0_i32_0 = arith.constant 0 : i32
    %c0_i32_1 = arith.constant 0 : i32
    return %c0_i32, %c0_i32_0 : i32, i32
  }
  func.func @transform_3(%arg0: i32) -> (i32, i32) {
    %c0_i32 = arith.constant 0 : i32
    %c0_i32_0 = arith.constant 0 : i32
    %c0_i32_1 = arith.constant 0 : i32
    return %c0_i32, %c0_i32_0 : i32, i32
  }
  func.func @transform_4(%arg0: i32) -> (i32, i32) {
    %c0_i32 = arith.constant 0 : i32
    %c0_i32_0 = arith.constant 0 : i32
    %c0_i32_1 = arith.constant 0 : i32
    return %c0_i32, %c0_i32_0 : i32, i32
  }
  func.func @transform_5(%arg0: i32) -> (i32, i32) {
    %c0_i32 = arith.constant 0 : i32
    %c0_i32_0 = arith.constant 0 : i32
    %c0_i32_1 = arith.constant 0 : i32
    return %c0_i32, %c0_i32_0 : i32, i32
  }
  func.func @transform_6(%arg0: i32) -> (i32, i32) {
    %c0_i32 = arith.constant 0 : i32
    %c0_i32_0 = arith.constant 0 : i32
    %c0_i32_1 = arith.constant 0 : i32
    return %c0_i32, %c0_i32_0 : i32, i32
  }
  func.func @transform_7(%arg0: i32) -> (i32, i32) {
    %c0_i32 = arith.constant 0 : i32
    %c0_i32_0 = arith.constant 0 : i32
    return %arg0, %c0_i32 : i32, i32
  }
}

</mosaic_0001>

<bundles_post_ra>
// kernel: tpu_custom_call.1
= control target key start
LH: loop header
LB: loop body
LE: loop exit
PB: predicated region body
PF: predicated region fallthrough
CT: control target
= control target key end

     0   :  { %12 = vsyncpa [#allocation3], 0  ;;  %s746_s0 = inlined_call_operand.vmem [shape: bf16[16,4], index: 0, kind: input, shape index: {}]   ;;  %s747_s1 = inlined_call_operand.vmem [shape: bf16[4,128], index: 1, kind: input, shape index: {}]   ;;  %s748_s2 = inlined_call_operand.vmem [shape: f32[1,128], index: 2, kind: input, shape index: {}]   ;;  %s749_s3 = inlined_call_operand.hbm [shape: bf16[128,256], index: 3, kind: input, shape index: {}]   ;;  %s750_s4 = inlined_call_operand.vmem [shape: f32[1,256], index: 4, kind: input, shape index: {}]   ;;  %s751_s5 = inlined_call_operand.hbm [shape: bf16[256,128], index: 5, kind: input, shape index: {}]   ;;  %s752_s6 = inlined_call_operand.vmem [shape: f32[1,128], index: 6, kind: input, shape index: {}]   ;;  %s753_s7 = inlined_call_operand.hbm [shape: f32[16,128], index: 7, kind: output, shape index: {}]  }
   0x1   :  { %13 = vsyncpa [#allocation6], 0 }
   0x2   :  { %14 = vsyncpa [#allocation4], 0  ;;  %s25_s26 = sshll.u32 %s749_s3, 4  ;;  %s668_s27 = smov [#allocation2]   ;;  %s26_s26 = int_to_ptr.hbm [resolvable:$true] %s25_s26 }
   0x3   :  { %s27_s28 = sshll.u32 %s668_s27, 4  ;;  %s40_s8 = sshll.u32 %s751_s5, 4  ;;  %s28_s28 = int_to_ptr.vmem [resolvable:$true] %s27_s28  ;;  %s41_s8 = int_to_ptr.hbm [resolvable:$true] %s40_s8 }
   0x4   :  { %s669_s9 = smov 128   ;;  %s670_s10 = smov 8  }
   0x5   :  { %33 = dma.hbm_to_vmem [thread:$0]  %s26_s26, 2048, %s28_s28, [#allocation3], %s669_s9, %s669_s9, %s670_s10  }
   0x6   :  { %s671_s11 = smov [#allocation5]   ;;  %s672_s13 = smov 64  }
   0x7   :  { %s42_s12 = sshll.u32 %s671_s11, 4  ;;  %s673_s3 = smov 4   ;;  %s43_s12 = int_to_ptr.vmem [resolvable:$true] %s42_s12 }
   0x8   :  { %48 = dma.hbm_to_vmem [thread:$0]  %s41_s8, 2048, %s43_s12, [#allocation6], %s672_s13, %s672_s13, %s673_s3  }
   0x9   :  { %662 = dma.done.wait [#allocation3], 2048  }
   0xa   :  { %663 = vsyncadd [#allocation3], 4294965248 }
   0xb   :  { %664 = dma.done.wait [#allocation6], 2048  }
   0xc   :  { %665 = vsyncadd [#allocation6], 4294965248  ;;  %vm76_vm0 = vcmask 1041408   ;;  %v62_v0 = vld [vmem:[%s747_s1] sm:$0x3]  ;;  %vm72_vm1 = vcmask 31744  }
   0xd   :  { %v478_v1 = vld [vmem:[#allocation2 + $0x70] sm:$0xf]  ;;  %v78_v2 = vsel %vm76_vm0, %v62_v0, 0  ;;  %v548_v3 = vld [vmem:[%s746_s0] sm:$0xff]  ;;  %v564_v4 = vld [vmem:[#allocation2 + $0x74] sm:$0xf0] }
   0xe   :  { %v563_v5 = vld [vmem:[#allocation2 + $0x74] sm:$0xf]  ;;  %87 = vmatpush.bf16.msra.mxu0 %v78_v2  ;;  %v479_v6 = vor.u32 %v564_v4, %v478_v1  ;;  %v480_v7 = vld [vmem:[#allocation2 + $0x78] sm:$0xf0]  ;;  %v470_v8 = vld [vmem:[#allocation2 + $0x60] sm:$0xf] }
   0xf   :  { %v562_v9 = vld [vmem:[#allocation2 + $0x64] sm:$0xf0]  ;;  %v483_v10 = vor.u32 %v563_v5, %v480_v7  ;;  %v561_v11 = vld [vmem:[#allocation2 + $0x64] sm:$0xf]  ;;  %v472_v12 = vld [vmem:[#allocation2 + $0x68] sm:$0xf0] }
  0x10   :  { %199 = vmatpush.bf16.msra.mxu1 %v479_v6  ;;  %v471_v13 = vor.u32 %v562_v9, %v470_v8  ;;  %v475_v14 = vor.u32 %v561_v11, %v472_v12  ;;  %v462_v15 = vld [vmem:[#allocation2 + $0x50] sm:$0xf]  ;;  %v560_v16 = vld [vmem:[#allocation2 + $0x54] sm:$0xf0]  ;;  %v559_v17 = vld [vmem:[#allocation2 + $0x54] sm:$0xf] }
  0x11   :  { %419 = vmatmul.msk.bf16.vlgmr.msra.gmra.mxu0 %vm72_vm1, %v548_v3  ;;  %213 = vmatpush.bf16.msra.mxu2 %v483_v10  ;;  %v464_v18 = vld [vmem:[#allocation2 + $0x58] sm:$0xf0]  ;;  %v463_v19 = vor.u32 %v560_v16, %v462_v15  ;;  %v454_v21 = vld [vmem:[#allocation2 + $0x40] sm:$0xf]  ;;  %v558_v22 = vld [vmem:[#allocation2 + $0x44] sm:$0xf0] }
  0x12   :  { %v467_v20 = vor.u32 %v559_v17, %v464_v18  ;;  %v557_v23 = vld [vmem:[#allocation2 + $0x44] sm:$0xf]  ;;  %v456_v24 = vld [vmem:[#allocation2 + $0x48] sm:$0xf0]  ;;  %v455_v25 = vor.u32 %v558_v22, %v454_v21  ;;  %v446_v27 = vld [vmem:[#allocation2 + $0x30] sm:$0xf] }
  0x13   :  { %v459_v26 = vor.u32 %v557_v23, %v456_v24  ;;  %v556_v28 = vld [vmem:[#allocation2 + $0x34] sm:$0xf0]  ;;  %v555_v29 = vld [vmem:[#allocation2 + $0x34] sm:$0xf]  ;;  %v448_v31 = vld [vmem:[#allocation2 + $0x38] sm:$0xf0] }
  0x14   :  { %200 = vmatpush.bf16.msra.mxu1 %v471_v13  ;;  %v447_v30 = vor.u32 %v556_v28, %v446_v27  ;;  %v451_v32 = vor.u32 %v555_v29, %v448_v31  ;;  %v438_v33 = vld [vmem:[#allocation2 + $0x20] sm:$0xf]  ;;  %v554_v34 = vld [vmem:[#allocation2 + $0x24] sm:$0xf0]  ;;  %v553_v35 = vld [vmem:[#allocation2 + $0x24] sm:$0xf] }
  0x15   :  { %214 = vmatpush.bf16.msra.mxu2 %v475_v14  ;;  %v439_v36 = vor.u32 %v554_v34, %v438_v33  ;;  %v440_v37 = vld [vmem:[#allocation2 + $0x28] sm:$0xf0]  ;;  %v430_v39 = vld [vmem:[#allocation2 + $0x10] sm:$0xf]  ;;  %v552_v40 = vld [vmem:[#allocation2 + $0x14] sm:$0xf0] }
  0x16   :  { %v443_v38 = vor.u32 %v553_v35, %v440_v37  ;;  %v551_v41 = vld [vmem:[#allocation2 + $0x14] sm:$0xf]  ;;  %v431_v42 = vor.u32 %v552_v40, %v430_v39  ;;  %v432_v43 = vld [vmem:[#allocation2 + $0x18] sm:$0xf0]  ;;  %v422_v45 = vld [vmem:[#allocation2] sm:$0xf] }
  0x17   :  { %v435_v44 = vor.u32 %v551_v41, %v432_v43  ;;  %v550_v46 = vld [vmem:[#allocation2 + $0x4] sm:$0xf0]  ;;  %v549_v47 = vld [vmem:[#allocation2 + $0x4] sm:$0xf]  ;;  %v424_v49 = vld [vmem:[#allocation2 + $0x8] sm:$0xf0] }
  0x18   :  { %201 = vmatpush.bf16.msra.mxu1 %v463_v19  ;;  %v423_v48 = vor.u32 %v550_v46, %v422_v45  ;;  %v427_v50 = vor.u32 %v549_v47, %v424_v49  ;;  %v572_v51 = vld [vmem:[#allocation5 + $0x38] sm:$0xff]  ;;  %v571_v53 = vld [vmem:[#allocation5 + $0x30] sm:$0xff]  ;;  %v570_v55 = vld [vmem:[#allocation5 + $0x28] sm:$0xff]  ;;  %s674_s19 = smov [#allocation7]   ;;  %s401_s23 = sshll.u32 %s753_s7, 4  ;;  %s402_s23 = int_to_ptr.hbm [resolvable:$true] %s401_s23 }
  0x19   :  { %215 = vmatpush.bf16.msra.mxu2 %v467_v20  ;;  %v580_v52 = vld [vmem:[#allocation5 + $0x78] sm:$0xff]  ;;  %365 = vmatpush.bf16.msra.mxu3 %v572_v51  ;;  %v579_v54 = vld [vmem:[#allocation5 + $0x70] sm:$0xff]  ;;  %v578_v56 = vld [vmem:[#allocation5 + $0x68] sm:$0xff]  ;;  %s399_s20 = sshll.u32 %s674_s19, 4  ;;  %s400_s20 = int_to_ptr.vmem [resolvable:$true] %s399_s20 }
  0x1a   :  { %379 = vmatpush.bf16.msrb.mxu0 %v580_v52  ;;  %v569_v57 = vld [vmem:[#allocation5 + $0x20] sm:$0xff]  ;;  %v568_v2 = vld [vmem:[#allocation5 + $0x18] sm:$0xff]  ;;  %v567_v4 = vld [vmem:[#allocation5 + $0x10] sm:$0xff] }
  0x1b   :  { %v588_v59 = vld [vmem:[%s748_s2] ss:$0 sm:$0xff]  ;;  %v576_v5 = vld [vmem:[#allocation5 + $0x58] sm:$0xff]  ;;  %v566_v6 = vld [vmem:[#allocation5 + $0x8] sm:$0xff] }
  0x1c   :  { %202 = vmatpush.bf16.msra.mxu1 %v455_v25  ;;  %v577_v3 = vld [vmem:[#allocation5 + $0x60] sm:$0xff]  ;;  %v575_v7 = vld [vmem:[#allocation5 + $0x50] sm:$0xff]  ;;  %v574_v9 = vld [vmem:[#allocation5 + $0x48] sm:$0xff] }
  0x1d   :  { %216 = vmatpush.bf16.msra.mxu2 %v459_v26  ;;  %366 = vmatpush.bf16.msra.mxu3 %v571_v53  ;;  %v565_v8 = vld [vmem:[#allocation5] sm:$0xff] }
  0x1e   :  { %380 = vmatpush.bf16.msrb.mxu0 %v579_v54  ;;  %v573_v10 = vld [vmem:[#allocation5 + $0x40] sm:$0xff] }
  0x1f   :  { %v113_v11 = vld [vmem:[%s750_s4] sm:$0x3] }
  0x20   :  { %203 = vmatpush.bf16.msra.mxu1 %v447_v30  ;;  %v115_v13 = vperm.slane %v113_v11, 0  ;;  %v116_v17 = vperm.slane %v113_v11, 1  ;;  %v589_v28 = vld [vmem:[%s752_s6] ss:$0 sm:$0xff] }
  0x21   :  { %217 = vmatpush.bf16.msra.mxu2 %v451_v32  ;;  %367 = vmatpush.bf16.msra.mxu3 %v570_v55 }
  0x22   :  { %381 = vmatpush.bf16.msrb.mxu0 %v578_v56 }
  0x24   :  { %204 = vmatpush.bf16.msra.mxu1 %v439_v36 }
  0x25   :  { %218 = vmatpush.bf16.msra.mxu2 %v443_v38  ;;  %368 = vmatpush.bf16.msra.mxu3 %v569_v57 }
  0x26   :  { %382 = vmatpush.bf16.msrb.mxu0 %v577_v3 }
  0x28   :  { %205 = vmatpush.bf16.msra.mxu1 %v431_v42 }
  0x29   :  { %219 = vmatpush.bf16.msra.mxu2 %v435_v44  ;;  %369 = vmatpush.bf16.msra.mxu3 %v568_v2 }
  0x2a   :  { %383 = vmatpush.bf16.msrb.mxu0 %v576_v5 }
  0x2c   :  { %206 = vmatpush.bf16.msra.mxu1 %v423_v48 }
  0x2d   :  { %220 = vmatpush.bf16.msra.mxu2 %v427_v50  ;;  %370 = vmatpush.bf16.msra.mxu3 %v567_v4 }
  0x2e   :  { %384 = vmatpush.bf16.msrb.mxu0 %v575_v7 }
  0x31   :  { %371 = vmatpush.bf16.msra.mxu3 %v566_v6 }
  0x32   :  { %385 = vmatpush.bf16.msrb.mxu0 %v574_v9 }
  0x35   :  { %372 = vmatpush.bf16.msra.mxu3 %v565_v8 }
  0x36   :  { %386 = vmatpush.bf16.msrb.mxu0 %v573_v10 }
  0x8e   :  { %v89_v58 = vpop.f32.mrf.mxu0 }
  0x8f   :  { %v90_v60 = vadd.f32 %v588_v59, %v89_v58 }
  0x91   :  { %v94_v63 = vmax.f32 %v90_v60, 0.0 }
  0x96   :  { %v91_v61 = vpop.f32.mrf.mxu0 }
  0x97   :  { %v92_v62 = vadd.f32 %v588_v59, %v91_v61 }
  0x99   :  { %v95_v0 = vmax.f32 %v92_v62, 0.0 }
  0x9b   :  { %v96_v1 = vpack.c.bf16 %v95_v0, %v94_v63 }
  0x9d   :  { %207 = vmatmul.bf16.vlgmr.msra.gmra.mxu1 %v96_v1  ;;  %221 = vmatmul.bf16.vlgmr.msra.gmra.mxu2 %v96_v1 }
 0x11a   :  { %v208_v12 = vpop.f32.mrf.mxu1 }
 0x11b   :  { %v209_v15 = vadd.f32 %v208_v12, %v115_v13 }
 0x11d   :  { %v227_v19 = vmax.f32 %v209_v15, 0.0 }
 0x120   :  { %v222_v14 = vpop.f32.mrf.mxu2 }
 0x121   :  { %v223_v21 = vadd.f32 %v222_v14, %v116_v17 }
 0x122   :  { %v210_v16 = vpop.f32.mrf.mxu1 }
 0x123   :  { %v211_v18 = vadd.f32 %v210_v16, %v115_v13  ;;  %v228_v25 = vmax.f32 %v223_v21, 0.0 }
 0x125   :  { %v229_v20 = vmax.f32 %v211_v18, 0.0 }
 0x127   :  { %v231_v22 = vpack.c.bf16 %v229_v20, %v227_v19 }
 0x128   :  { %v224_v23 = vpop.f32.mrf.mxu2 }
 0x129   :  { %v225_v24 = vadd.f32 %v224_v23, %v116_v17  ;;  %373 = vmatmul.bf16.vlgmr.msra.gmra.mxu3 %v231_v22 }
 0x12b   :  { %v230_v26 = vmax.f32 %v225_v24, 0.0 }
 0x12d   :  { %v232_v27 = vpack.c.bf16 %v230_v26, %v228_v25 }
 0x12f   :  { %387 = vmatmul.bf16.vlgmr.msrb.gmra.mxu0 %v232_v27 }
 0x1ac   :  { %v374_v29 = vpop.f32.mrf.mxu3  ;;  %v388_v30 = vpop.f32.mrf.mxu0 }
 0x1ad   :  { %v375_v31 = vadd.f32 %v589_v28, %v374_v29 }
 0x1af   :  { %v389_v32 = vadd.f32 %v388_v30, %v375_v31 }
 0x1b1   :  { %393 = vst [vmem:[#allocation7] sm:$0xff] %v389_v32 }
 0x1b4   :  { %v376_v33 = vpop.f32.mrf.mxu3  ;;  %v390_v35 = vpop.f32.mrf.mxu0 }
 0x1b5   :  { %v377_v34 = vadd.f32 %v589_v28, %v376_v33 }
 0x1b7   :  { %v391_v36 = vadd.f32 %v390_v35, %v377_v34 }
 0x1b9   :  { %394 = vst [vmem:[#allocation7 + $0x8] sm:$0xff] %v391_v36 }
 0x1ba   :  { %407 = dma.vmem_to_hbm [thread:$0]  %s400_s20, 256, %s402_s23, [#allocation4], %s669_s9, %s669_s9, %s670_s10  }
 0x1bb   :  { %666 = dma.done.wait [#allocation4], 256  }
 0x1bc   :  { %667 = vsyncadd [#allocation4], 4294967040 }
 0x1bd   :  { %412 = vsyncpa [#allocation3], 1 }
 0x1be   :  { %413 = vsyncpa [#allocation6], 1 }
 0x1bf   :  { %414 = vsyncpa [#allocation4], 1 }

</bundles_post_ra>
